<compile_context>
chip_gen: v7x
topology: tpu7x:2x2x1
jax: 0.10.0
libtpu: 0.0.40
codegen_flags: <defaults>
</compile_context>

<pallas_src>
import functools

import jax
import jax.numpy as jnp
from jax.experimental import pallas as pl
from jax.experimental.pallas import tpu as pltpu


# ---------------------------------------------------------------------------
# Fused SE-block kernel (one grid step == TB batch elements)
# ---------------------------------------------------------------------------
def _se_block_kernel(x_ref, w1t_ref, b1_ref, w2t_ref, b2_ref, o_ref, *, inv_hw):
    # x_ref  : (TB, C, HWp)  channels on sublanes, spatial (lane-dense) on lanes
    # w1t_ref: (C, Cr)       FC1 = Conv2d(C, Cr, 1) weight, pre-transposed
    # b1_ref : (1, Cr)
    # w2t_ref: (Cr, C)       FC2 = Conv2d(Cr, C, 1) weight, pre-transposed
    # b2_ref : (1, C)
    # o_ref  : (TB, C, HWp)

    # Squeeze: global average pool over the (zero-padded) spatial lane axis.
    # f32 accumulation; inv_hw is 1/true_HW so padding is exact.  (tile read #1)
    m = jnp.sum(x_ref[...].astype(jnp.float32), axis=-1) * inv_hw        # (TB, C)

    # Excitation: batched tiny MLP — one well-shaped MXU matmul per FC.
    h = jnp.dot(m, w1t_ref[...], preferred_element_type=jnp.float32) + b1_ref[...]
    h = jnp.maximum(h, 0.0)                                              # (TB, Cr)
    z = jnp.dot(h, w2t_ref[...], preferred_element_type=jnp.float32) + b2_ref[...]
    s = jax.nn.sigmoid(z)                                                # (TB, C) f32

    # Scale: re-read the tile from VMEM (don't keep it live across the gate
    # math — vld slots are free in an HBM-bound kernel).  (tile read #2)
    o_ref[...] = (x_ref[...].astype(jnp.float32) * s[:, :, None]).astype(o_ref.dtype)


# ---------------------------------------------------------------------------
# Wrapper
# ---------------------------------------------------------------------------
def se_block(x_nchw, w1, b1, w2, b2):
    """SeBlock forward.

    x: (N, C, H, W); w1: (Cr, C); b1: (Cr,); w2: (C, Cr); b2: (C,).
    Works for f32 (tested) and bf16 feature maps (gate math stays f32).
    """
    N, C, H, W = x_nchw.shape
    Cr = w1.shape[0]
    HW = H * W
    dtype = x_nchw.dtype
    itemsize = jnp.dtype(dtype).itemsize

    # --- lane-dense layout: pad spatial axis to a multiple of 128 -----------
    # (unmasked full-lane vst; zero padding is exact because the pool divides
    #  by the true HW and padded outputs are sliced off below).
    HWp = ((HW + 127) // 128) * 128
    x2 = x_nchw.reshape(N, C, HW)
    if HWp != HW:
        x2 = jnp.pad(x2, ((0, 0), (0, 0), (0, HWp - HW)))

    # --- pick the batch-tile size TB ----------------------------------------
    per_elem_bytes = C * HWp * itemsize
    target_bytes = 2 << 20          # ~2 MiB payload per grid step (amortize ~0.35us/step)
    vmem_cap = 40 << 20             # double-buffered in+out ~= 4 * tile bytes; v7x-safe
    tb = max(1, min(target_bytes // per_elem_bytes,
                    vmem_cap // (4 * per_elem_bytes)))
    tb = int(min(tb, N))
    if N >= 2:
        # keep >= 2 grid steps so both TensorCores on v7x get work
        tb = int(min(tb, -(-N // 2)))
    grid_n = -(-N // tb)
    Np = grid_n * tb
    if Np != N:
        x2 = jnp.pad(x2, ((0, Np - N), (0, 0), (0, 0)))   # zero rows -> sliced off

    # TODO(synk): if a single batch element alone exceeds the VMEM cap
    # (C*HWp*itemsize > vmem_cap/4), additionally tile over the spatial axis
    # (partial-sum pass + scale pass); unnecessary at these sizes.

    # Tiny weights: pre-transpose outside (one-time, negligible) so the kernel
    # does plain row-major matmuls; biases as (1, ·) rows for broadcasting.
    w1t = jnp.asarray(w1, jnp.float32).T          # (C, Cr)
    w2t = jnp.asarray(w2, jnp.float32).T          # (Cr, C)
    b1r = jnp.asarray(b1, jnp.float32).reshape(1, Cr)
    b2r = jnp.asarray(b2, jnp.float32).reshape(1, C)

    kernel = functools.partial(_se_block_kernel, inv_hw=1.0 / float(HW))

    flops = int(2 * Np * C * HWp + 4 * Np * C * Cr)
    bytes_accessed = int(itemsize * 2 * Np * C * HWp + 4 * (2 * C * Cr + Cr + C))

    out = pl.pallas_call(
        kernel,
        out_shape=jax.ShapeDtypeStruct((Np, C, HWp), dtype),
        grid_spec=pltpu.PrefetchScalarGridSpec(
            num_scalar_prefetch=0,
            grid=(grid_n,),
            in_specs=[
                pl.BlockSpec((tb, C, HWp), lambda n: (n, 0, 0)),   # feature-map tile
                pl.BlockSpec((C, Cr), lambda n: (0, 0)),           # resident weights
                pl.BlockSpec((1, Cr), lambda n: (0, 0)),
                pl.BlockSpec((Cr, C), lambda n: (0, 0)),
                pl.BlockSpec((1, C), lambda n: (0, 0)),
            ],
            out_specs=pl.BlockSpec((tb, C, HWp), lambda n: (n, 0, 0)),
        ),
        compiler_params=pltpu.CompilerParams(
            dimension_semantics=("parallel",),     # batch tiles -> megacore / 2 TCs
            vmem_limit_bytes=48 << 20,             # explicit bound, v7x-safe (<64 MiB)
        ),
        cost_estimate=pl.CostEstimate(
            flops=flops, transcendentals=int(Np * C), bytes_accessed=bytes_accessed),
    )(x2, w1t, b1r, w2t, b2r)

    return out[:N, :, :HW].reshape(N, C, H, W)


# ---------------------------------------------------------------------------
# Pure-JAX reference (for verification)
# ---------------------------------------------------------------------------
def se_block_ref(x, w1, b1, w2, b2):
    m = jnp.mean(x, axis=(2, 3))                               # (N, C)
    h = jnp.maximum(m @ w1.T + b1, 0.0)                        # (N, Cr)
    z = h @ w2.T + b2                                          # (N, C)
    s = jax.nn.sigmoid(z)[:, :, None, None]                    # (N, C, 1, 1)
    return x * s


# ---------------------------------------------------------------------------
if __name__ == "__main__":
    key = jax.random.PRNGKey(0)

    def run_case(key, N, C, H, W, reduction):
        Cr = C // reduction
        k1, k2, k3, k4, k5 = jax.random.split(key, 5)
        x = jax.random.normal(k1, (N, C, H, W), jnp.float32)
        w1 = jax.random.normal(k2, (Cr, C), jnp.float32) * (1.0 / jnp.sqrt(C))
        b1 = 0.1 * jax.random.normal(k3, (Cr,), jnp.float32)
        w2 = jax.random.normal(k4, (C, Cr), jnp.float32) * (1.0 / jnp.sqrt(Cr))
        b2 = 0.1 * jax.random.normal(k5, (C,), jnp.float32)

        out = jax.block_until_ready(se_block(x, w1, b1, w2, b2))
        assert out.shape == (N, C, H, W), out.shape
        ref = jax.block_until_ready(se_block_ref(x, w1, b1, w2, b2))
        err = float(jnp.max(jnp.abs(out - ref)))
        assert jnp.allclose(out, ref, atol=1e-5, rtol=1e-5), err

    k1, k2 = jax.random.split(key)
    # Lane-aligned spatial (HW = 256), batch of 2.
    run_case(k1, N=2, C=32, H=16, W=16, reduction=4)
    # Non-aligned spatial (HW = 49 -> padded to 128) + ragged batch tiling.
    run_case(k2, N=3, C=8, H=7, W=7, reduction=4)

    print("KERNEL_OK")
</pallas_src>

<mosaic_0001>
module attributes {stable_mosaic.version = 11 : i64} {
  func.func @_se_block_kernel(%arg0: i32, %arg1: memref<1x32x256xf32, #tpu.memory_space<vmem>>, %arg2: memref<32x8xf32, #tpu.memory_space<vmem>>, %arg3: memref<1x8xf32, #tpu.memory_space<vmem>>, %arg4: memref<8x32xf32, #tpu.memory_space<vmem>>, %arg5: memref<1x32xf32, #tpu.memory_space<vmem>>, %arg6: memref<1x32x256xf32, #tpu.memory_space<vmem>>) attributes {dimension_semantics = [#tpu.dimension_semantics<parallel>], iteration_bounds = array<i64: 2>, scalar_prefetch = 0 : i64, scratch_operands = 0 : i64, tpu.core_type = #tpu.core_type<tc>, window_params = [{transform_indices = @transform_0, window_bounds = array<i64: 1, 32, 256>}, {pipeline_mode = #tpu.pipeline_mode<synchronous>, transform_indices = @transform_1, window_bounds = array<i64: 32, 8>}, {pipeline_mode = #tpu.pipeline_mode<synchronous>, transform_indices = @transform_2, window_bounds = array<i64: 1, 8>}, {pipeline_mode = #tpu.pipeline_mode<synchronous>, transform_indices = @transform_3, window_bounds = array<i64: 8, 32>}, {pipeline_mode = #tpu.pipeline_mode<synchronous>, transform_indices = @transform_4, window_bounds = array<i64: 1, 32>}, {transform_indices = @transform_5, window_bounds = array<i64: 1, 32, 256>}]} {
    %c0 = arith.constant 0 : index
    %c0_0 = arith.constant 0 : index
    %c0_1 = arith.constant 0 : index
    %0 = vector.load %arg1[%c0, %c0_0, %c0_1] : memref<1x32x256xf32, #tpu.memory_space<vmem>>, vector<1x32x256xf32>
    %cst = arith.constant dense<0.000000e+00> : vector<1x32xf32>
    %1 = vector.multi_reduction <add>, %0, %cst [2] : vector<1x32x256xf32> to vector<1x32xf32>
    %cst_2 = arith.constant 3.906250e-03 : f32
    %2 = vector.broadcast %cst_2 : f32 to vector<1x32xf32>
    %3 = arith.mulf %1, %2 : vector<1x32xf32>
    %c0_3 = arith.constant 0 : index
    %c0_4 = arith.constant 0 : index
    %4 = vector.load %arg2[%c0_3, %c0_4] : memref<32x8xf32, #tpu.memory_space<vmem>>, vector<32x8xf32>
    %cst_5 = arith.constant dense<0.000000e+00> : vector<1x8xf32>
    %5 = tpu.matmul %3, %4, %cst_5 {dimension_numbers = #tpu.dot_dimension_numbers<[1], [0], [0], [1], [0, 0, 1, 1], [], []>} : vector<1x32xf32>, vector<32x8xf32>, vector<1x8xf32> -> vector<1x8xf32>
    %c0_6 = arith.constant 0 : index
    %c0_7 = arith.constant 0 : index
    %6 = vector.load %arg3[%c0_6, %c0_7] : memref<1x8xf32, #tpu.memory_space<vmem>>, vector<1x8xf32>
    %7 = arith.addf %5, %6 : vector<1x8xf32>
    %cst_8 = arith.constant 0.000000e+00 : f32
    %8 = vector.broadcast %cst_8 : f32 to vector<1x8xf32>
    %9 = arith.maximumf %7, %8 : vector<1x8xf32>
    %c0_9 = arith.constant 0 : index
    %c0_10 = arith.constant 0 : index
    %10 = vector.load %arg4[%c0_9, %c0_10] : memref<8x32xf32, #tpu.memory_space<vmem>>, vector<8x32xf32>
    %cst_11 = arith.constant dense<0.000000e+00> : vector<1x32xf32>
    %11 = tpu.matmul %9, %10, %cst_11 {dimension_numbers = #tpu.dot_dimension_numbers<[1], [0], [0], [1], [0, 0, 1, 1], [], []>} : vector<1x8xf32>, vector<8x32xf32>, vector<1x32xf32> -> vector<1x32xf32>
    %c0_12 = arith.constant 0 : index
    %c0_13 = arith.constant 0 : index
    %12 = vector.load %arg5[%c0_12, %c0_13] : memref<1x32xf32, #tpu.memory_space<vmem>>, vector<1x32xf32>
    %13 = arith.addf %11, %12 : vector<1x32xf32>
    %14 = arith.negf %13 : vector<1x32xf32>
    %15 = math.exp %14 : vector<1x32xf32>
    %cst_14 = arith.constant 1.000000e+00 : f32
    %16 = vector.broadcast %cst_14 : f32 to vector<1x32xf32>
    %17 = arith.addf %16, %15 : vector<1x32xf32>
    %18 = arith.divf %16, %17 : vector<1x32xf32>
    %c0_15 = arith.constant 0 : index
    %c0_16 = arith.constant 0 : index
    %c0_17 = arith.constant 0 : index
    %19 = vector.load %arg1[%c0_15, %c0_16, %c0_17] : memref<1x32x256xf32, #tpu.memory_space<vmem>>, vector<1x32x256xf32>
    %20 = vector.shape_cast %18 : vector<1x32xf32> to vector<1x32x1xf32>
    %21 = vector.broadcast %20 : vector<1x32x1xf32> to vector<1x32x256xf32>
    %22 = arith.mulf %19, %21 : vector<1x32x256xf32>
    %c0_18 = arith.constant 0 : index
    %c0_19 = arith.constant 0 : index
    %c0_20 = arith.constant 0 : index
    %23 = vector.load %arg6[%c0_18, %c0_19, %c0_20] : memref<1x32x256xf32, #tpu.memory_space<vmem>>, vector<1x32x256xf32>
    tpu.vector_store %arg6[%c0_18, %c0_19, %c0_20], %22 {strides = array<i32>} : memref<1x32x256xf32, #tpu.memory_space<vmem>>, vector<1x32x256xf32>,
    return
  }
  func.func @transform_0(%arg0: i32) -> (i32, i32, i32) {
    %c0_i32 = arith.constant 0 : i32
    %c0_i32_0 = arith.constant 0 : i32
    %c0_i32_1 = arith.constant 0 : i32
    return %arg0, %c0_i32, %c0_i32_0 : i32, i32, i32
  }
  func.func @transform_1(%arg0: i32) -> (i32, i32) {
    %c0_i32 = arith.constant 0 : i32
    %c0_i32_0 = arith.constant 0 : i32
    %c0_i32_1 = arith.constant 0 : i32
    return %c0_i32, %c0_i32_0 : i32, i32
  }
  func.func @transform_2(%arg0: i32) -> (i32, i32) {
    %c0_i32 = arith.constant 0 : i32
    %c0_i32_0 = arith.constant 0 : i32
    %c0_i32_1 = arith.constant 0 : i32
    return %c0_i32, %c0_i32_0 : i32, i32
  }
  func.func @transform_3(%arg0: i32) -> (i32, i32) {
    %c0_i32 = arith.constant 0 : i32
    %c0_i32_0 = arith.constant 0 : i32
    %c0_i32_1 = arith.constant 0 : i32
    return %c0_i32, %c0_i32_0 : i32, i32
  }
  func.func @transform_4(%arg0: i32) -> (i32, i32) {
    %c0_i32 = arith.constant 0 : i32
    %c0_i32_0 = arith.constant 0 : i32
    %c0_i32_1 = arith.constant 0 : i32
    return %c0_i32, %c0_i32_0 : i32, i32
  }
  func.func @transform_5(%arg0: i32) -> (i32, i32, i32) {
    %c0_i32 = arith.constant 0 : i32
    %c0_i32_0 = arith.constant 0 : i32
    %c0_i32_1 = arith.constant 0 : i32
    return %arg0, %c0_i32, %c0_i32_0 : i32, i32, i32
  }
}

</mosaic_0001>

<bundles_post_ra>
// kernel: tpu_custom_call.1
= control target key start
LH: loop header
LB: loop body
LE: loop exit
PB: predicated region body
PF: predicated region fallthrough
CT: control target
= control target key end

     0   :  { %10 = vsyncpa [#allocation3], 0  ;;  %s1042_s0 = inlined_call_operand.hbm [shape: f32[2,32,256], index: 0, kind: input, shape index: {}]   ;;  %s1043_s1 = inlined_call_operand.vmem [shape: f32[32,8], index: 1, kind: input, shape index: {}]   ;;  %s1044_s2 = inlined_call_operand.vmem [shape: f32[1,8], index: 2, kind: input, shape index: {}]   ;;  %s1045_s3 = inlined_call_operand.vmem [shape: f32[8,32], index: 3, kind: input, shape index: {}]   ;;  %s1046_s4 = inlined_call_operand.vmem [shape: f32[1,32], index: 4, kind: input, shape index: {}]   ;;  %s1047_s5 = inlined_call_operand.hbm [shape: f32[2,32,256], index: 5, kind: output, shape index: {}]  }
   0x1   :  { %12 = vsyncpa [#allocation3 + $0x1], 0 }
   0x2   :  { %13 = vsyncpa [#allocation4], 0 }
   0x3   :  { %15 = vsyncpa [#allocation4 + $0x1], 0  ;;  %s823_s18 = smov 0   ;;  %s825_s19 = smov 0  }
   0x4   :  { %s827_s20 = smov 0   ;;  %s829_s21 = smov 0  }
   0x5 LB: > { %s844_s22 = sadd.s32 4294967295, %s782_s21   ;;  %s581_s23 = sadd.s32 4294967294, %s782_s21   ;;  %s782_s21 = sphi %s829_s21, %s1060_s21   ;;  %s778_s20 = sphi %s827_s20, %s1059_s20   ;;  %s774_s19 = sphi %s825_s19, %s1058_s19   ;;  %s770_s18 = sphi %s823_s18, %s1057_s18  }
   0x6   : > { %s848_s24 = sadd.s32 1, %s782_s21   ;;  %s28_s25 = sadd.s32 1, %s778_s20 }
   0x7   : > { %s25_s26 = ssub.s32 %s782_s21, %s848_s24  ;;  %p35_p0 = scmp.ne.s32.totalorder %s778_s20, %s774_s19 }
   0x8   : > { %p26_p1 = scmp.eq.s32.totalorder %s25_s26, 0  ;;  %p36_p2 = scmp.eq.s32.totalorder %s782_s21, 0 }
   0x9   : > { %p41_p3 = scmp.ne.s32.totalorder %s774_s19, %s770_s18  ;;  %p42_p4 = scmp.eq.s32.totalorder %s844_s22, 0 }
   0xa   : > { %s860_s27 = scalar_select %p26_p1, %s778_s20, %s28_s25  }
   0xb   : > { %p862_p5 = por %p36_p2, %p35_p0  ;;  %p866_p6 = por %p42_p4, %p41_p3 }
   0xc   : > { %p149_p7 = scmp.eq.s32.totalorder %s844_s22, 1  ;;  %p155_p8 = scmp.eq.s32.totalorder %s581_s23, 1 }
   0xd   : > { %p641_p10 = scmp.lt.s32.totalorder %s782_s21, 2  ;;  %s187_s7 = sand.u32 1, %s778_s20  }
   0xe   : > { %p873_p11 = por %p149_p7, %p35_p0  ;;  %p877_p12 = por %p155_p8, %p41_p3 }
   0xf   : > { %s598_s8 = sshll.u32 %s782_s21, 10  ;;  %s584_s9 = sshll.u32 %s187_s7, 6 }
  0x10   : > { %s1051_s30 = scalar_select %p873_p11, 1, 0 }
  0x11   : > { %s1052_s6 = scalar_select %p877_p12, 1, 0 }
  0x12   : > { %s886_s12 = scalar_lea.hbm %s1042_s0, %s598_s8  ;;  %s191_s13 = scalar_lea.vmem [#allocation2], %s584_s9 }
  0x13   : > { %s198_s14 = sshll.u32 %s191_s13, 4  ;;  %p890_p13 = pnand %p641_p10, %p862_p5  ;;  %s894_s14 = int_to_ptr.vmem [resolvable:$true] %s198_s14 }
  0x14   : > { %s896_s16 = scalar_lea.sflag [#allocation3], %s187_s7  ;;  %s686_s17 = scalar_lea.hbm %s886_s12, 1024 }
  0x15   : > { %p687_p0 = scmp.ne.s32.totalorder %s886_s12, %s686_s17  ;;  %p688_p1 = pneg %p890_p13 }
  0x16   : > { %s691_s26 = scalar_lea.hbm %s1042_s0, 2048  ;;  %p692_p4 = scmp.lt.u32.totalorder %s886_s12, %s1042_s0 }
  0x17   : > { %p689_p2 = pnand %p688_p1, %p687_p0  ;;  %p693_p5 = scmp.lt.u32.totalorder %s691_s26, %s686_s17 }
  0x18   : > { %p695_p8 = scmp.lt.u32.totalorder %s686_s17, %s886_s12 }
  0x19   : > { %p690_p3 = pneg %p689_p2  ;;  %p694_p7 = por %p693_p5, %p692_p4 }
  0x1b   : > { %p696_p10 = por %p695_p8, %p694_p7 }
  0x1d   : > { %p697_p9 = pnand %p696_p10, %p690_p3 }
  0x1f   : > { %700 = shalt.err (!%p697_p9)
}
  0x20   : > { %s701_s7 = scalar_lea.vmem %s894_s14, 1024  ;;  %s784_s9 = smov [#allocation2]  }
  0x21   : > { %p702_p0 = scmp.ne.s32.totalorder %s894_s14, %s701_s7  ;;  %s706_s10 = sshll.u32 %s784_s9, 4  ;;  %s707_s10 = int_to_ptr.vmem [resolvable:$false] %s706_s10 }
  0x22   : > { %s708_s11 = scalar_lea.vmem %s707_s10, 2048  ;;  %p709_p11 = scmp.lt.s32.totalorder %s894_s14, %s707_s10 }
  0x23   : > { %p704_p2 = pnand %p702_p0, %p688_p1  ;;  %p710_p4 = scmp.lt.s32.totalorder %s708_s11, %s701_s7 }
  0x25   : > { %p705_p12 = pneg %p704_p2  ;;  %p711_p5 = por %p710_p4, %p709_p11 }
  0x27   : > { %p712_p7 = pnand %p711_p5, %p705_p12 }
  0x29   : > { %715 = shalt.err (!%p712_p7)
}
  0x2a   : > { %s785_s13 = smov 256   ;;  %s786_s17 = smov 16  }
  0x2b   : > { %636 = dma.hbm_to_vmem [thread:$0]  (!%p890_p13), %s886_s12, 1024, %s894_s14, %s896_s16, %s785_s13, %s785_s13, %s786_s17  }
  0x2c   : > { %p587_p9 = scmp.ge.s32.totalorder %s782_s21, 1  ;;  %p206_p1 = scmp.lt.s32.totalorder %s782_s21, 3 }
  0x2e   : > { %p207_p3 = pnand %p587_p9, %p206_p1 }
  0x2f   : > { %s927_s23 = sand.u32 (!%p207_p3), 1, %s774_s19  }
  0x30   : > { %210 = sbr.rel (%p207_p3) target bundleno = 810 (0x32a), region = 40  ;;  %s588_s25 = sshll.u32 (!%p207_p3), %s927_s23, 6 }
  0x31   : > { %s213_s26 = scalar_lea.sflag (!%p207_p3), [#allocation3], %s927_s23  ;;  %s216_s28 = scalar_lea.vmem (!%p207_p3), [#allocation2], %s588_s25 }
  0x37   : > { %761 = dma.done.wait (%p866_p6), %s213_s26, 1024  }
  0x38   : > { %763 = vsyncadd (%p866_p6), %s213_s26, 4294966272  ;;  %v937_v0 = vld [vmem:[%s216_s28] sm:$0xff]  ;;  %v939_v1 = vld [vmem:[%s216_s28 + $0x8] sm:$0xff]  ;;  %v787_v15 = vmov 0.0|0.0   ;;  %vm788_vm0 = vmmov 0   ;;  %v789_v19 = vmov 0.0   ;;  %v276_v20 = vlaneseq }
  0x39   : > { %v941_v2 = vld [vmem:[%s216_s28 + $0x20] sm:$0xff]  ;;  %v251_v3 = vadd.f32 %v939_v1, %v937_v0  ;;  %v945_v4 = vld [vmem:[%s216_s28 + $0x28] sm:$0xff]  ;;  %v947_v5 = vld [vmem:[%s216_s28 + $0x10] sm:$0xff]  ;;  %623 = vmatprep.subr.bf16.mxu0 %v787_v15  ;;  %615 = vmatprep.mubr.msk.f32.mxu0 %vm788_vm0, %v789_v19  ;;  %vm287_vm1 = vcmask 130112   ;;  %vm294_vm2 = vcmask 195712   ;;  %vm301_vm3 = vcmask 261312  }
  0x3a   : > { %v949_v6 = vld [vmem:[%s216_s28 + $0x18] sm:$0xff]  ;;  %v257_v7 = vadd.f32 %v945_v4, %v941_v2  ;;  %v953_v8 = vld [vmem:[%s216_s28 + $0x30] sm:$0xff]  ;;  %v267_v12 = vld [vmem:[%s1043_s1] sm:$0xff]  ;;  %618 = vmatprep.subr.mxu1 %v789_v19  ;;  %620 = vmatprep.mubr.msk.f32.mxu1 %vm788_vm0, %v789_v19  ;;  %v277_v21 = vand.u32 127, %v276_v20  ;;  %v279_v22 = vshrl.u32 %v276_v20, 7  ;;  %vm303_vm4 = vcmask 261120  }
  0x3b   : > { %v955_v9 = vld [vmem:[%s216_s28 + $0x38] sm:$0xff]  ;;  %252 = vadd.xlane.f32.xlu0 %v251_v3  ;;  %v254_v10 = vadd.f32 %v949_v6, %v947_v5  ;;  %v268_v13 = vld [vmem:[%s1043_s1 + $0x8] sm:$0xff]  ;;  %v269_v16 = vld [vmem:[%s1043_s1 + $0x10] sm:$0xff]  ;;  %vm379_vm5 = vcmask 64512   ;;  %s242_s29 = scalar_lea.vmem [#allocation5], %s588_s25  ;;  %s599_s14 = sshll.u32 %s844_s22, 10 }
  0x3c   : > { %258 = vadd.xlane.f32.xlu1 %v257_v7  ;;  %v260_v11 = vadd.f32 %v955_v9, %v953_v8  ;;  %v624_v14 = vpack.c.bf16 %v268_v13, %v267_v12  ;;  %v270_v17 = vld [vmem:[%s1043_s1 + $0x18] sm:$0xff]  ;;  %v282_v23 = vadd.s32 4294967288, %v277_v21  ;;  %v289_v25 = vadd.s32 4294967280, %v277_v21  ;;  %v377_v45 = vld [vmem:[%s1045_s3] sm:$0xff]  ;;  %s508_s12 = sshll.u32 %s242_s29, 4  ;;  %s996_s16 = scalar_lea.hbm %s1047_s5, %s599_s14  ;;  %s991_s12 = int_to_ptr.vmem [resolvable:$true] %s508_s12 }
  0x3d   : > { %v627_v18 = vpack.c.bf16 %v270_v17, %v269_v16  ;;  %v296_v26 = vadd.s32 4294967272, %v277_v21  ;;  %v280_v28 = vsub.s32 %v277_v21, %v279_v22  ;;  %619 = vmatpush3.msra.mxu1 %v377_v45  ;;  %v271_v46 = vld [vmem:[%s1044_s2] sm:$0x1]  ;;  %v461_v58 = vsub.s32 0, %v279_v22  ;;  %s495_s22 = scalar_lea.sflag [#allocation4], %s927_s23  ;;  %s716_s8 = scalar_lea.vmem %s991_s12, 1024 }
  0x3e   : > { %625 = vmatpush3.bf16.msra.mxu0 %v624_v14  ;;  %v285_v30 = vsub.s32 %v282_v23, %v279_v22  ;;  %v292_v31 = vsub.s32 %v289_v25, %v279_v22  ;;  %v378_v51 = vld [vmem:[%s1046_s4] sm:$0x1]  ;;  %p717_p6 = scmp.ne.s32.totalorder %s991_s12, %s716_s8  ;;  %p1054_p11 = scmp.ne.s32.totalorder %s1051_s30, 0 }
  0x3f   : > { %255 = vadd.xlane.f32.xlu0 %v254_v10  ;;  %626 = vmatprep.subr.bf16.mxu0 %v787_v15  ;;  %v299_v34 = vsub.s32 %v296_v26, %v279_v22  ;;  %s790_s7 = smov [#allocation5]  }
  0x40   : > { %261 = vadd.xlane.f32.xlu1 %v260_v11  ;;  %p718_p12 = pnand %p717_p6, %p1054_p11  ;;  %s720_s9 = sshll.u32 %s790_s7, 4  ;;  %s721_s9 = int_to_ptr.vmem [resolvable:$false] %s720_s9 }
  0x41   : > { %s722_s10 = scalar_lea.vmem %s721_s9, 2048  ;;  %p723_p8 = scmp.lt.s32.totalorder %s991_s12, %s721_s9 }
  0x42   : > { %628 = vmatpush3.bf16.msra.mxu0 %v627_v18  ;;  %p719_p13 = pneg %p718_p12  ;;  %p724_p10 = scmp.lt.s32.totalorder %s722_s10, %s716_s8 }
  0x44   : > { %p725_p0 = por %p724_p10, %p723_p8 }
  0x46   : > { %p726_p2 = pnand %p725_p0, %p719_p13 }
  0xc8   : > { %v253_v24 = vpop.xlane.xlu0 %252 }
  0xc9   : > { %v259_v27 = vpop.xlane.xlu1 %258  ;;  %v263_v29 = vmul.f32 0.00390625, %v253_v24 }
  0xca   : > { %v265_v32 = vmul.f32 0.00390625, %v259_v27 }
  0xcb   : > { %v281_v38 = vrot.slane %v263_v29, %v280_v28 }
  0xcc   : > { %v256_v33 = vpop.xlane.xlu0 %255  ;;  %v293_v40 = vrot.slane %v265_v32, %v292_v31 }
  0xcd   : > { %v264_v35 = vmul.f32 0.00390625, %v256_v33  ;;  %v262_v36 = vpop.xlane.xlu1 %261 }
  0xce   : > { %v266_v37 = vmul.f32 0.00390625, %v262_v36 }
  0xcf   : > { %v286_v39 = vrot.slane %v264_v35, %v285_v30 }
  0xd0   : > { %v300_v41 = vrot.slane %v266_v37, %v299_v34 }
  0xd1   : > { %v288_v42 = vsel %vm287_vm1, %v286_v39, %v281_v38 }
  0xd2   : > { %v295_v43 = vsel %vm294_vm2, %v293_v40, %v288_v42 }
  0xd3   : > { %v302_v44 = vsel %vm301_vm3, %v300_v41, %v295_v43 }
  0xd4   : > { %616 = vmatmul.mubr.msk.f32.vlgmr.msra.gmra.mrb[0].mxu0 %vm303_vm4, %v302_v44 }
 0x1a7   : > { %v372_v47 = vpop.f32.mrb[0].mxu0 }
 0x1a8   : > { %v373_v48 = vadd.f32 %v372_v47, %v271_v46  ;;  %v617_v49 = vpop.f32.mrb[1].mxu0 }
 0x1aa   : > { %v376_v50 = vmax.f32 %v373_v48, 0.0 }
 0x1ac   : > { %621 = vmatmul.mubr.msk.f32.vlgmr.msra.gmra.mrb[0].mxu1 %vm379_vm5, %v376_v50 }
 0x27f   : > { %v449_v52 = vpop.f32.mrb[0].mxu1 }
 0x280   : > { %v450_v53 = vadd.f32 %v449_v52, %v378_v51  ;;  %v622_v54 = vpop.f32.mrb[1].mxu1 }
 0x282   : > { %v592_v55 = vmul.f32 -1.442695, %v450_v53 }
 0x284   : > { %682 = vpow2.f32 %v592_v55 }
 0x28e   : > { %v683_v56 = vpop.eup %682 }
 0x28f   : > { %v456_v57 = vadd.f32 1.0, %v683_v56 }
 0x291   : > { %684 = vrcp.f32 %v456_v57 }
 0x29b   : > { %v685_v59 = vpop.eup %684 }
 0x29c   : > { %v462_v60 = vrot.slane %v685_v59, %v461_v58 }
 0x29e   : > { %468 = vbcast.lane.b32.xlu1 %v462_v60, 264  ;;  %464 = vbcast.lane.b32.xlu0 %v462_v60, 256 }
 0x2a2   : > { %472 = vbcast.lane.b32.xlu1 %v462_v60, 272 }
 0x2a6   : > { %476 = vbcast.lane.b32.xlu1 %v462_v60, 280 }
 0x310   : > { %v469_v61 = vpop.permute.xlu1 %468  ;;  %v465_v62 = vpop.permute.xlu0 %464 }
 0x311   : > { %v480_v63 = vmul.f32 %v469_v61, %v947_v5  ;;  %v481_v3 = vmul.f32 %v469_v61, %v949_v6  ;;  %v478_v7 = vmul.f32 %v465_v62, %v937_v0  ;;  %v479_v10 = vmul.f32 %v465_v62, %v939_v1 }
 0x313   : > { %488 = vst [vmem:[%s242_s29 + $0x10] sm:$0xff] %v480_v63  ;;  %489 = vst [vmem:[%s242_s29 + $0x18] sm:$0xff] %v481_v3 }
 0x314   : > { %486 = vst [vmem:[%s242_s29] sm:$0xff] %v478_v7  ;;  %487 = vst [vmem:[%s242_s29 + $0x8] sm:$0xff] %v479_v10  ;;  %v473_v11 = vpop.permute.xlu1 %472 }
 0x315   : > { %v482_v12 = vmul.f32 %v473_v11, %v941_v2  ;;  %v483_v5 = vmul.f32 %v473_v11, %v945_v4 }
 0x317   : > { %490 = vst [vmem:[%s242_s29 + $0x20] sm:$0xff] %v482_v12  ;;  %491 = vst [vmem:[%s242_s29 + $0x28] sm:$0xff] %v483_v5 }
 0x318   : > { %v477_v0 = vpop.permute.xlu1 %476 }
 0x319   : > { %v484_v1 = vmul.f32 %v477_v0, %v953_v8  ;;  %v485_v2 = vmul.f32 %v477_v0, %v955_v9 }
 0x31b   : > { %492 = vst [vmem:[%s242_s29 + $0x30] sm:$0xff] %v484_v1  ;;  %493 = vst [vmem:[%s242_s29 + $0x38] sm:$0xff] %v485_v2 }
 0x31c   : > { %729 = shalt.err (!%p726_p2)
}
 0x31d   : > { %s730_s11 = scalar_lea.hbm %s996_s16, 1024  ;;  %s734_s26 = scalar_lea.hbm %s1047_s5, 2048 }
 0x31e   : > { %p731_p4 = scmp.ne.s32.totalorder %s996_s16, %s730_s11  ;;  %p735_p9 = scmp.lt.u32.totalorder %s996_s16, %s1047_s5 }
 0x31f   : > { %p736_p1 = scmp.lt.u32.totalorder %s734_s26, %s730_s11  ;;  %p738_p6 = scmp.lt.u32.totalorder %s730_s11, %s996_s16 }
 0x320   : > { %p732_p5 = pnand %p731_p4, %p1054_p11 }
 0x321   : > { %p737_p3 = por %p736_p1, %p735_p9 }
 0x322   : > { %p733_p7 = pneg %p732_p5 }
 0x323   : > { %p739_p12 = por %p738_p6, %p737_p3 }
 0x325   : > { %p740_p13 = pnand %p739_p12, %p733_p7 }
 0x327   : > { %743 = shalt.err (!%p740_p13)
}
 0x328   : > { %s791_s14 = smov 256   ;;  %s792_s25 = smov 16  }
 0x329   : > { %631 = dma.vmem_to_hbm [thread:$0]  (%p1054_p11), %s991_s12, 1024, %s996_s16, %s495_s22, %s791_s14, %s791_s14, %s792_s25  }
 0x32a PF: > { %s523_s15 = sand.u32 1, %s770_s18   ;;  %p1055_p8 = scmp.ne.s32.totalorder %s1052_s6, 0 }
 0x32b   : > { %p1056_p10 = scmp.ge.s32.totalorder %s782_s21, 2  ;;  %s524_s8 = scalar_lea.sflag [#allocation4], %s523_s15 }
 0x32d   : > { %p638_p0 = pnand %p1056_p10, %p1055_p8 }
 0x32f   : > { %765 = dma.done.wait (!%p638_p0), %s524_s8, 1024  }
 0x330   : > { %767 = vsyncadd (!%p638_p0), %s524_s8, 4294966272  ;;  %p18_p2 = scmp.ge.s32.totalorder %s848_s24, 4   ;;  %s1057_s18 = smov %s774_s19 }
 0x331   : > { %s1058_s19 = smov %s778_s20  ;;  %s1059_s20 = smov %s860_s27 }
 0x332   : > { %s1060_s21 = smov %s848_s24  ;;  %20 = sbr.rel (!%p18_p2) target bundleno = 5 (0x5), region = 85 }
 0x339   :  { %529 = vsyncpa [#allocation3], 1 }
 0x33a   :  { %531 = vsyncpa [#allocation3 + $0x1], 1 }
 0x33b   :  { %532 = vsyncpa [#allocation4], 1 }
 0x33c   :  { %534 = vsyncpa [#allocation4 + $0x1], 1 }

</bundles_post_ra>
